<compile_context>
chip_gen: v7x
topology: tpu7x:2x2x1
jax: 0.10.0
libtpu: 0.0.40
codegen_flags: <defaults>
</compile_context>

<pallas_src>
import jax
import jax.numpy as jnp
from jax import lax
from jax.experimental import pallas as pl
from jax.experimental.pallas import tpu as pltpu

# ---- model hyper-parameters (small, consistent with the module) ----
NUM_USERS     = 10
NUM_ITEMS     = 20
EMBEDDING_DIM = 16
NUM_EXPERTS   = 4
EXPERT_HIDDEN = 32
NUM_TASKS     = 2
TOWER_HIDDEN  = 16
BATCH         = 8
INPUT_DIM     = 2 * EMBEDDING_DIM

EH    = NUM_EXPERTS * EXPERT_HIDDEN      # 128 : fused expert lane width
TTH   = NUM_TASKS * TOWER_HIDDEN         # 32  : fused tower-hidden lane width
LANES = 128

# ---- selection-matrix (z) column layout ----
BIAS_COL = NUM_USERS + NUM_ITEMS                       # 30: constant-1 column (bias row select)
Z_DIM    = ((NUM_USERS + NUM_ITEMS + 1 + 7) // 8) * 8  # 32: 8-aligned contraction dim

# ---- parameter-slab row layout (128 lanes wide, 8-row aligned) ----
R_W2   = 0                               # [EH, EH]        block-diag expert layer-2
R_WT1  = R_W2 + EH                       # [T*EH, LANES]   block-diag row-tiled tower layer-1 (cols >= TTH zero)
R_WT2  = R_WT1 + NUM_TASKS * EH          # [EH, LANES]     tower layer-2 block (valid [TTH, T], rest zero)
R_B2   = R_WT2 + EH                      # [BATCH, LANES]  b2 pre-tiled over batch rows
R_BT1  = R_B2 + BATCH                    # [BATCH, LANES]  bt1 pre-tiled (cols >= TTH zero)
R_BT2  = R_BT1 + BATCH                   # [BATCH, LANES]  bt2 pre-tiled (cols >= T zero)
PSLAB_ROWS = ((R_BT2 + BATCH + 7) // 8) * 8            # 536


def mmoe_kernel(idx_ref, wfused_ref, p_ref, out_ref):
    f32 = jnp.float32

    # ---- build the one-hot / ones selection matrix z from the indices ----
    idx = idx_ref[...]                                            # [B, 2] int32
    uid = idx[:, 0:1]                                             # user index  (0..NUM_USERS-1)
    iid = idx[:, 1:2] + NUM_USERS                                 # item index shifted into its column range
    iota = lax.broadcasted_iota(jnp.int32, (BATCH, Z_DIM), 1)
    z = jnp.logical_or(jnp.logical_or(iota == uid, iota == iid),
                       iota == BIAS_COL).astype(f32)              # [B, Z_DIM]

    # ---- fused: embedding lookup + expert layer-1 + gate logits + all their biases ----
    pre = jnp.dot(z, wfused_ref[...], preferred_element_type=f32)  # [B, (1+T)*EH]

    # ---- experts: ReLU(layer-1), then one block-diagonal layer-2 matmul ----
    h1 = jnp.maximum(pre[:, :EH], 0.0)                             # [B, EH]
    b2 = p_ref[R_B2:R_B2 + BATCH, :]                               # pre-tiled: plain elementwise add
    h2 = jnp.maximum(
        jnp.dot(h1, p_ref[R_W2:R_W2 + EH, :], preferred_element_type=f32) + b2,
        0.0)                                                       # [B, EH] (all experts, lane-packed)

    # ---- per-task softmax gate on lane-repeated logits; gated expert mixture ----
    gated_parts = []
    for t in range(NUM_TASKS):
        g = pre[:, EH * (1 + t): EH * (2 + t)]                     # [B, EH] logits repeated in groups of H
        m = jnp.max(g, axis=1, keepdims=True)                      # == max over distinct logits
        e = jnp.exp(g - m)
        s = jnp.sum(e, axis=1, keepdims=True)                      # == H * softmax denominator
        gate = e * (float(EXPERT_HIDDEN) * pl.reciprocal(s))       # exact reciprocal (tolerance)
        gated_parts.append(h2 * gate)                              # [B, EH]
    gated = jnp.concatenate(gated_parts, axis=1)                   # [B, T*EH]

    # ---- towers, both tasks at once (mixture folded into row-tiled block-diag WT1) ----
    bt1 = p_ref[R_BT1:R_BT1 + BATCH, :]
    th = jnp.maximum(
        jnp.dot(gated, p_ref[R_WT1:R_WT1 + NUM_TASKS * EH, :],
                preferred_element_type=f32) + bt1,
        0.0)                                                       # [B, LANES] (cols >= TTH exactly 0)
    bt2 = p_ref[R_BT2:R_BT2 + BATCH, :]
    out = jnp.dot(th, p_ref[R_WT2:R_WT2 + EH, :],
                  preferred_element_type=f32) + bt2                # [B, LANES] (cols >= T exactly 0)

    # lane-dense store; the [:, :NUM_TASKS] slice happens in the wrapper.
    out_ref[...] = out


def fuse_params(user_tbl, item_tbl, params):
    """Fold embedding tables, projection weights and all biases into two lane-dense buffers."""
    (w1, b1, w2, b2, wg, bg, wt1, bt1, wt2, bt2) = params
    E, IN, H = w1.shape
    T = wg.shape[0]
    TH = wt1.shape[2]
    eh = E * H
    emb = user_tbl.shape[1]

    # fused input projection weight over the real feature axis: [IN, (1+T)*EH]
    w1_f = jnp.transpose(w1, (1, 0, 2)).reshape(IN, eh)            # experts layer-1
    wg_rep = jnp.repeat(wg, H, axis=2)                             # [T, IN, E*H] lane-repeated gate weights
    wg_rep = jnp.transpose(wg_rep, (1, 0, 2)).reshape(IN, T * eh)
    w_in = jnp.concatenate([w1_f, wg_rep], axis=1)                 # [IN, (1+T)*EH]

    # bias row for the fused dot (b1 + lane-repeated gate biases)
    bias_row = jnp.concatenate(
        [b1.reshape(eh)] + [jnp.repeat(bg[t], H) for t in range(T)])   # [(1+T)*EH]

    # fold embedding tables into the projection: rows of w_fused are selected by the one-hot z
    w_user = user_tbl @ w_in[:emb]                                 # [NUM_USERS, (1+T)*EH]
    w_item = item_tbl @ w_in[emb:2 * emb]                          # [NUM_ITEMS, (1+T)*EH]
    w_fused = jnp.zeros((Z_DIM, (1 + T) * eh), jnp.float32)
    w_fused = w_fused.at[:NUM_USERS].set(w_user)
    w_fused = w_fused.at[NUM_USERS:NUM_USERS + NUM_ITEMS].set(w_item)
    w_fused = w_fused.at[BIAS_COL].set(bias_row)                   # constant-1 column selects this row

    pslab = jnp.zeros((PSLAB_ROWS, LANES), jnp.float32)

    # expert layer-2: block-diagonal [EH, EH]
    for e in range(E):
        pslab = pslab.at[R_W2 + e * H: R_W2 + (e + 1) * H,
                         e * H:(e + 1) * H].set(w2[e])

    # tower layer-1: block-diag of row-tiled wt1 (so the gated mixture folds into the matmul)
    for t in range(T):
        pslab = pslab.at[R_WT1 + t * eh: R_WT1 + (t + 1) * eh,
                         t * TH:(t + 1) * TH].set(jnp.tile(wt1[t], (E, 1)))

    # tower layer-2: [TTH, T] block inside a zero-padded [EH, LANES] slot
    for t in range(T):
        pslab = pslab.at[R_WT2 + t * TH: R_WT2 + (t + 1) * TH, t].set(wt2[t, :, 0])

    # remaining biases, pre-tiled to BATCH rows (plain elementwise adds in-kernel)
    pslab = pslab.at[R_B2:R_B2 + BATCH, :eh].set(jnp.tile(b2.reshape(1, eh), (BATCH, 1)))
    pslab = pslab.at[R_BT1:R_BT1 + BATCH, :T * TH].set(jnp.tile(bt1.reshape(1, T * TH), (BATCH, 1)))
    pslab = pslab.at[R_BT2:R_BT2 + BATCH, :T].set(jnp.tile(bt2.reshape(1, T), (BATCH, 1)))
    return w_fused.astype(jnp.float32), pslab


def mmoe_forward(user_idx, item_idx, fused_params):
    w_fused, pslab = fused_params
    idx = jnp.stack([user_idx, item_idx], axis=1).astype(jnp.int32)      # [B, 2]
    out = pl.pallas_call(
        mmoe_kernel,
        out_shape=jax.ShapeDtypeStruct((idx.shape[0], LANES), jnp.float32),   # lane-dense output
        in_specs=[pl.BlockSpec(memory_space=pltpu.MemorySpace.VMEM),
                  pl.BlockSpec(memory_space=pltpu.MemorySpace.VMEM),
                  pl.BlockSpec(memory_space=pltpu.MemorySpace.VMEM)],
        out_specs=pl.BlockSpec(memory_space=pltpu.MemorySpace.VMEM),
    )(idx, w_fused, pslab)
    # mirror the PyTorch API: list of [B] arrays, one per task
    return [out[:, t] for t in range(NUM_TASKS)]


def init_params(key):
    ks = jax.random.split(key, 12)
    scale = 0.1
    user_emb_tbl = scale * jax.random.normal(ks[0], (NUM_USERS, EMBEDDING_DIM), jnp.float32)
    item_emb_tbl = scale * jax.random.normal(ks[1], (NUM_ITEMS, EMBEDDING_DIM), jnp.float32)

    w1  = scale * jax.random.normal(ks[2],  (NUM_EXPERTS, INPUT_DIM, EXPERT_HIDDEN), jnp.float32)
    b1  = scale * jax.random.normal(ks[3],  (NUM_EXPERTS, EXPERT_HIDDEN), jnp.float32)
    w2  = scale * jax.random.normal(ks[4],  (NUM_EXPERTS, EXPERT_HIDDEN, EXPERT_HIDDEN), jnp.float32)
    b2  = scale * jax.random.normal(ks[5],  (NUM_EXPERTS, EXPERT_HIDDEN), jnp.float32)
    wg  = scale * jax.random.normal(ks[6],  (NUM_TASKS, INPUT_DIM, NUM_EXPERTS), jnp.float32)
    bg  = scale * jax.random.normal(ks[7],  (NUM_TASKS, NUM_EXPERTS), jnp.float32)
    wt1 = scale * jax.random.normal(ks[8],  (NUM_TASKS, EXPERT_HIDDEN, TOWER_HIDDEN), jnp.float32)
    bt1 = scale * jax.random.normal(ks[9],  (NUM_TASKS, TOWER_HIDDEN), jnp.float32)
    wt2 = scale * jax.random.normal(ks[10], (NUM_TASKS, TOWER_HIDDEN, 1), jnp.float32)
    bt2 = scale * jax.random.normal(ks[11], (NUM_TASKS, 1), jnp.float32)
    return (user_emb_tbl, item_emb_tbl,
            (w1, b1, w2, b2, wg, bg, wt1, bt1, wt2, bt2))


def reference_forward(x, params):
    """Pure-JAX reference identical to the PyTorch semantics, for verification."""
    (w1, b1, w2, b2, wg, bg, wt1, bt1, wt2, bt2) = params
    expert_outs = []
    for e in range(NUM_EXPERTS):
        h1 = jax.nn.relu(x @ w1[e] + b1[e])
        h2 = jax.nn.relu(h1 @ w2[e] + b2[e])
        expert_outs.append(h2)
    expert_stack = jnp.stack(expert_outs, axis=2)              # [B, H, E]
    outs = []
    for t in range(NUM_TASKS):
        gate = jax.nn.softmax(x @ wg[t] + bg[t], axis=1)       # [B, E]
        mmoe = jnp.einsum('bhe,be->bh', expert_stack, gate)
        th = jax.nn.relu(mmoe @ wt1[t] + bt1[t])
        o = (th @ wt2[t] + bt2[t])[:, 0]
        outs.append(o)
    return outs


if __name__ == "__main__":
    key = jax.random.PRNGKey(0)
    k_param, k_user, k_item = jax.random.split(key, 3)

    user_emb_tbl, item_emb_tbl, params = init_params(k_param)
    fused = fuse_params(user_emb_tbl, item_emb_tbl, params)

    user_idx = jax.random.randint(k_user, (BATCH,), 0, NUM_USERS)
    item_idx = jax.random.randint(k_item, (BATCH,), 0, NUM_ITEMS)

    outs = mmoe_forward(user_idx, item_idx, fused)
    outs = [jax.block_until_ready(o) for o in outs]

    # reference (embedding lookup done the PyTorch way)
    user_emb = user_emb_tbl[user_idx]
    item_emb = item_emb_tbl[item_idx]
    x = jnp.concatenate([user_emb, item_emb], axis=1)
    refs = reference_forward(x, params)
    for o, r in zip(outs, refs):
        assert o.shape == (BATCH,)
        # fused summation order differs slightly from the reference -> small tolerance headroom
        assert jnp.allclose(o, r, atol=5e-5, rtol=5e-5)

    print("KERNEL_OK")
</pallas_src>

<mosaic_0001>
module attributes {stable_mosaic.version = 11 : i64} {
  func.func @mmoe_kernel(%arg0: memref<8x2xi32, #tpu.memory_space<vmem>>, %arg1: memref<32x384xf32, #tpu.memory_space<vmem>>, %arg2: memref<536x128xf32, #tpu.memory_space<vmem>>, %arg3: memref<8x128xf32, #tpu.memory_space<vmem>>) attributes {dimension_semantics = [], scalar_prefetch = 0 : i64, scratch_operands = 0 : i64, tpu.core_type = #tpu.core_type<tc>} {
    %c0 = arith.constant 0 : index
    %c0_0 = arith.constant 0 : index
    %0 = vector.load %arg0[%c0, %c0_0] : memref<8x2xi32, #tpu.memory_space<vmem>>, vector<8x2xi32>
    %1 = vector.extract_strided_slice %0 {offsets = [0, 0], sizes = [8, 1], strides = [1, 1]} : vector<8x2xi32> to vector<8x1xi32>
    %2 = vector.extract_strided_slice %0 {offsets = [0, 1], sizes = [8, 1], strides = [1, 1]} : vector<8x2xi32> to vector<8x1xi32>
    %c10_i32 = arith.constant 10 : i32
    %3 = vector.broadcast %c10_i32 : i32 to vector<8x1xi32>
    %4 = arith.addi %2, %3 : vector<8x1xi32>
    %5 = tpu.iota {dimensions = array<i32: 1>} : vector<8x32xi32>
    %6 = vector.broadcast %1 : vector<8x1xi32> to vector<8x32xi32>
    %7 = arith.cmpi eq, %5, %6 : vector<8x32xi32>
    %8 = vector.broadcast %4 : vector<8x1xi32> to vector<8x32xi32>
    %9 = arith.cmpi eq, %5, %8 : vector<8x32xi32>
    %10 = arith.ori %7, %9 : vector<8x32xi1>
    %c30_i32 = arith.constant 30 : i32
    %11 = vector.broadcast %c30_i32 : i32 to vector<8x32xi32>
    %12 = arith.cmpi eq, %5, %11 : vector<8x32xi32>
    %13 = arith.ori %10, %12 : vector<8x32xi1>
    %14 = arith.extui %13 : vector<8x32xi1> to vector<8x32xi32>
    %15 = arith.sitofp %14 : vector<8x32xi32> to vector<8x32xf32>
    %c0_1 = arith.constant 0 : index
    %c0_2 = arith.constant 0 : index
    %16 = vector.load %arg1[%c0_1, %c0_2] : memref<32x384xf32, #tpu.memory_space<vmem>>, vector<32x384xf32>
    %cst = arith.constant dense<0.000000e+00> : vector<8x384xf32>
    %17 = tpu.matmul %15, %16, %cst {dimension_numbers = #tpu.dot_dimension_numbers<[1], [0], [0], [1], [0, 0, 1, 1], [], []>} : vector<8x32xf32>, vector<32x384xf32>, vector<8x384xf32> -> vector<8x384xf32>
    %18 = vector.extract_strided_slice %17 {offsets = [0, 0], sizes = [8, 128], strides = [1, 1]} : vector<8x384xf32> to vector<8x128xf32>
    %cst_3 = arith.constant 0.000000e+00 : f32
    %19 = vector.broadcast %cst_3 : f32 to vector<8x128xf32>
    %20 = arith.maximumf %18, %19 : vector<8x128xf32>
    %c512 = arith.constant 512 : index
    %c0_4 = arith.constant 0 : index
    %21 = vector.load %arg2[%c512, %c0_4] : memref<536x128xf32, #tpu.memory_space<vmem>>, vector<8x128xf32>
    %c0_5 = arith.constant 0 : index
    %c0_6 = arith.constant 0 : index
    %22 = vector.load %arg2[%c0_5, %c0_6] : memref<536x128xf32, #tpu.memory_space<vmem>>, vector<128x128xf32>
    %cst_7 = arith.constant dense<0.000000e+00> : vector<8x128xf32>
    %23 = tpu.matmul %20, %22, %cst_7 {dimension_numbers = #tpu.dot_dimension_numbers<[1], [0], [0], [1], [0, 0, 1, 1], [], []>} : vector<8x128xf32>, vector<128x128xf32>, vector<8x128xf32> -> vector<8x128xf32>
    %24 = arith.addf %23, %21 : vector<8x128xf32>
    %cst_8 = arith.constant 0.000000e+00 : f32
    %25 = vector.broadcast %cst_8 : f32 to vector<8x128xf32>
    %26 = arith.maximumf %24, %25 : vector<8x128xf32>
    %27 = vector.extract_strided_slice %17 {offsets = [0, 128], sizes = [8, 128], strides = [1, 1]} : vector<8x384xf32> to vector<8x128xf32>
    %cst_9 = arith.constant dense<0xFF800000> : vector<8xf32>
    %28 = vector.multi_reduction <maximumf>, %27, %cst_9 [1] : vector<8x128xf32> to vector<8xf32>
    %29 = vector.shape_cast %28 : vector<8xf32> to vector<8x1xf32>
    %30 = vector.broadcast %29 : vector<8x1xf32> to vector<8x128xf32>
    %31 = arith.subf %27, %30 : vector<8x128xf32>
    %32 = math.exp %31 : vector<8x128xf32>
    %cst_10 = arith.constant dense<0.000000e+00> : vector<8xf32>
    %33 = vector.multi_reduction <add>, %32, %cst_10 [1] : vector<8x128xf32> to vector<8xf32>
    %34 = vector.shape_cast %33 : vector<8xf32> to vector<8x1xf32>
    %35 = tpu.reciprocal %34 : vector<8x1xf32> -> vector<8x1xf32>
    %cst_11 = arith.constant 3.200000e+01 : f32
    %36 = vector.broadcast %cst_11 : f32 to vector<8x1xf32>
    %37 = arith.mulf %36, %35 : vector<8x1xf32>
    %38 = vector.broadcast %37 : vector<8x1xf32> to vector<8x128xf32>
    %39 = arith.mulf %32, %38 : vector<8x128xf32>
    %40 = arith.mulf %26, %39 : vector<8x128xf32>
    %41 = vector.extract_strided_slice %17 {offsets = [0, 256], sizes = [8, 128], strides = [1, 1]} : vector<8x384xf32> to vector<8x128xf32>
    %cst_12 = arith.constant dense<0xFF800000> : vector<8xf32>
    %42 = vector.multi_reduction <maximumf>, %41, %cst_12 [1] : vector<8x128xf32> to vector<8xf32>
    %43 = vector.shape_cast %42 : vector<8xf32> to vector<8x1xf32>
    %44 = vector.broadcast %43 : vector<8x1xf32> to vector<8x128xf32>
    %45 = arith.subf %41, %44 : vector<8x128xf32>
    %46 = math.exp %45 : vector<8x128xf32>
    %cst_13 = arith.constant dense<0.000000e+00> : vector<8xf32>
    %47 = vector.multi_reduction <add>, %46, %cst_13 [1] : vector<8x128xf32> to vector<8xf32>
    %48 = vector.shape_cast %47 : vector<8xf32> to vector<8x1xf32>
    %49 = tpu.reciprocal %48 : vector<8x1xf32> -> vector<8x1xf32>
    %cst_14 = arith.constant 3.200000e+01 : f32
    %50 = vector.broadcast %cst_14 : f32 to vector<8x1xf32>
    %51 = arith.mulf %50, %49 : vector<8x1xf32>
    %52 = vector.broadcast %51 : vector<8x1xf32> to vector<8x128xf32>
    %53 = arith.mulf %46, %52 : vector<8x128xf32>
    %54 = arith.mulf %26, %53 : vector<8x128xf32>
    %55 = tpu.concatenate %40, %54 in 1 : vector<8x128xf32>, vector<8x128xf32> -> vector<8x256xf32>
    %c520 = arith.constant 520 : index
    %c0_15 = arith.constant 0 : index
    %56 = vector.load %arg2[%c520, %c0_15] : memref<536x128xf32, #tpu.memory_space<vmem>>, vector<8x128xf32>
    %c128 = arith.constant 128 : index
    %c0_16 = arith.constant 0 : index
    %57 = vector.load %arg2[%c128, %c0_16] : memref<536x128xf32, #tpu.memory_space<vmem>>, vector<256x128xf32>
    %cst_17 = arith.constant dense<0.000000e+00> : vector<8x128xf32>
    %58 = tpu.matmul %55, %57, %cst_17 {dimension_numbers = #tpu.dot_dimension_numbers<[1], [0], [0], [1], [0, 0, 1, 1], [], []>} : vector<8x256xf32>, vector<256x128xf32>, vector<8x128xf32> -> vector<8x128xf32>
    %59 = arith.addf %58, %56 : vector<8x128xf32>
    %cst_18 = arith.constant 0.000000e+00 : f32
    %60 = vector.broadcast %cst_18 : f32 to vector<8x128xf32>
    %61 = arith.maximumf %59, %60 : vector<8x128xf32>
    %c528 = arith.constant 528 : index
    %c0_19 = arith.constant 0 : index
    %62 = vector.load %arg2[%c528, %c0_19] : memref<536x128xf32, #tpu.memory_space<vmem>>, vector<8x128xf32>
    %c384 = arith.constant 384 : index
    %c0_20 = arith.constant 0 : index
    %63 = vector.load %arg2[%c384, %c0_20] : memref<536x128xf32, #tpu.memory_space<vmem>>, vector<128x128xf32>
    %cst_21 = arith.constant dense<0.000000e+00> : vector<8x128xf32>
    %64 = tpu.matmul %61, %63, %cst_21 {dimension_numbers = #tpu.dot_dimension_numbers<[1], [0], [0], [1], [0, 0, 1, 1], [], []>} : vector<8x128xf32>, vector<128x128xf32>, vector<8x128xf32> -> vector<8x128xf32>
    %65 = arith.addf %64, %62 : vector<8x128xf32>
    %c0_22 = arith.constant 0 : index
    %c0_23 = arith.constant 0 : index
    %66 = vector.load %arg3[%c0_22, %c0_23] : memref<8x128xf32, #tpu.memory_space<vmem>>, vector<8x128xf32>
    tpu.vector_store %arg3[%c0_22, %c0_23], %65 {strides = array<i32>} : memref<8x128xf32, #tpu.memory_space<vmem>>, vector<8x128xf32>,
    return
  }
}

</mosaic_0001>

<bundles_post_ra>
// kernel: tpu_custom_call.1
= control target key start
LH: loop header
LB: loop body
LE: loop exit
PB: predicated region body
PF: predicated region fallthrough
CT: control target
= control target key end

     0   :  { %8 = vsyncpa [#allocation3], 0  ;;  %s987_s0 = inlined_call_operand.vmem [shape: s32[8,2], index: 0, kind: input, shape index: {}]   ;;  %s988_s1 = inlined_call_operand.hbm [shape: f32[32,384], index: 1, kind: input, shape index: {}]   ;;  %s989_s2 = inlined_call_operand.hbm [shape: f32[536,128], index: 2, kind: input, shape index: {}]   ;;  %s990_s3 = inlined_call_operand.hbm [shape: f32[8,128], index: 3, kind: output, shape index: {}]  }
   0x1   :  { %9 = vsyncpa [#allocation6], 0 }
   0x2   :  { %10 = vsyncpa [#allocation4], 0  ;;  %s882_s12 = smov [#allocation2]   ;;  %s810_s16 = scalar_lea.hbm %s988_s1, 1536 }
   0x3   :  { %s18_s13 = sshll.u32 %s882_s12, 4  ;;  %p811_p0 = scmp.ne.s32.totalorder %s988_s1, %s810_s16  ;;  %s19_s13 = int_to_ptr.vmem [resolvable:$true] %s18_s13 }
   0x4   :  { %p814_p1 = scmp.lt.u32.totalorder %s810_s16, %s988_s1 }
   0x6   :  { %p816_p2 = pnand %p814_p1, %p811_p0 }
   0x8   :  { %819 = shalt.err (!%p816_p2)
}
   0x9   :  { %s820_s21 = scalar_lea.vmem %s19_s13, 1536  ;;  %p825_p4 = scmp.lt.s32.totalorder %s19_s13, %s19_s13 }
   0xa   :  { %p821_p3 = scmp.ne.s32.totalorder %s19_s13, %s820_s21  ;;  %p826_p5 = scmp.lt.s32.totalorder %s820_s21, %s820_s21 }
   0xc   :  { %p827_p6 = por %p826_p5, %p825_p4 }
   0xe   :  { %p828_p7 = pnand %p827_p6, %p821_p3 }
  0x10   :  { %831 = shalt.err (!%p828_p7)
}
  0x11   :  { %s883_s22 = smov 384   ;;  %s884_s23 = smov 24  }
  0x12   :  { %24 = dma.hbm_to_vmem [thread:$0]  %s988_s1, 1536, %s19_s13, [#allocation3], %s883_s22, %s883_s22, %s884_s23  }
  0x13   :  { %s885_s26 = smov [#allocation5]   ;;  %s832_s30 = scalar_lea.hbm %s989_s2, 8576 }
  0x14   :  { %s30_s27 = sshll.u32 %s885_s26, 4  ;;  %p833_p8 = scmp.ne.s32.totalorder %s989_s2, %s832_s30  ;;  %s31_s27 = int_to_ptr.vmem [resolvable:$true] %s30_s27 }
  0x15   :  { %p836_p9 = scmp.lt.u32.totalorder %s832_s30, %s989_s2 }
  0x17   :  { %p838_p10 = pnand %p836_p9, %p833_p8 }
  0x19   :  { %841 = shalt.err (!%p838_p10)
}
  0x1a   :  { %s842_s8 = scalar_lea.vmem %s31_s27, 8576  ;;  %p847_p12 = scmp.lt.s32.totalorder %s31_s27, %s31_s27 }
  0x1b   :  { %p843_p11 = scmp.ne.s32.totalorder %s31_s27, %s842_s8  ;;  %p848_p13 = scmp.lt.s32.totalorder %s842_s8, %s842_s8 }
  0x1d   :  { %p849_p0 = por %p848_p13, %p847_p12 }
  0x1f   :  { %p850_p1 = pnand %p849_p0, %p843_p11 }
  0x21   :  { %853 = shalt.err (!%p850_p1)
}
  0x22   :  { %s886_s1 = smov 128   ;;  %s887_s9 = smov 8  }
  0x23   :  { %36 = dma.hbm_to_vmem [thread:$0]  %s989_s2, 8576, %s31_s27, [#allocation6], %s886_s1, %s886_s1, %s887_s9  }
  0x24   :  { %876 = dma.done.wait [#allocation3], 1536  }
  0x25   :  { %877 = vsyncadd [#allocation3], 4294965760 }
  0x26   :  { %878 = dma.done.wait [#allocation6], 8576  }
  0x27   :  { %879 = vsyncadd [#allocation6], 4294958720  ;;  %v888_v0 = vmov 0   ;;  %v43_v1 = vld [vmem:[%s987_s0] sm:$0xff]  ;;  %v61_v2 = vld [vmem:[#allocation2 + $0x8] sm:$0xff]  ;;  %v889_v15 = vmov 1   ;;  %v45_v39 = vlaneseq }
  0x28   :  { %800 = vset.pattern.permute.xlu0 %v888_v0  ;;  %v64_v3 = vld [vmem:[#allocation2 + $0x20] sm:$0xff]  ;;  %v63_v6 = vld [vmem:[#allocation2 + $0x18] sm:$0xff]  ;;  %v44_v8 = vadd.s32 10, %v43_v1  ;;  %v70_v10 = vld [vmem:[#allocation2 + $0x50] sm:$0xff]  ;;  %v890_v16 = vmov 0.0   ;;  %v891_v17 = vmov 0.0|0.0  }
  0x29   :  { %48 = vperm.xlu0 %800, %v43_v1   ;;  %v694_v4 = vpack.c.bf16 %v64_v3, %v61_v2  ;;  %v60_v5 = vld [vmem:[#allocation2] sm:$0xff]  ;;  %v67_v7 = vld [vmem:[#allocation2 + $0x38] sm:$0xff]  ;;  %v66_v12 = vld [vmem:[#allocation2 + $0x30] sm:$0xff]  ;;  %140 = vmatprep.mubr.f32.mxu1 %v890_v16  ;;  %vm892_vm0 = vmmov 0   ;;  %v46_v41 = vand.u32 127, %v45_v39  ;;  %vm72_vm5 = vcmask 261120  }
  0x2a   :  { %v696_v9 = vpack.c.bf16 %v63_v6, %v60_v5  ;;  %v698_v11 = vpack.c.bf16 %v70_v10, %v67_v7  ;;  %v69_v13 = vld [vmem:[#allocation2 + $0x48] sm:$0xff]  ;;  %708 = vmatprep.subr.bf16.mxu0 %v891_v17  ;;  %656 = vmatprep.mubr.msk.f32.mxu0 %vm892_vm0, %v890_v16  ;;  %v219_v18 = vld [vmem:[#allocation5] sm:$0xff]  ;;  %v221_v20 = vld [vmem:[#allocation5 + $0x10] sm:$0xff]  ;;  %s893_s0 = smov [#allocation7]  }
  0x2b   :  { %695 = vmatprep.subr.bf16.mxu1 %v694_v4  ;;  %v700_v14 = vpack.c.bf16 %v69_v13, %v66_v12  ;;  %v220_v19 = vld [vmem:[#allocation5 + $0x8] sm:$0xff]  ;;  %v222_v22 = vld [vmem:[#allocation5 + $0x18] sm:$0xff]  ;;  %v223_v24 = vld [vmem:[#allocation5 + $0x20] sm:$0xff]  ;;  %vm56_vm1 = vcmp.eq.s32.totalorder %v46_v41, 30  ;;  %s526_s2 = sshll.u32 %s893_s0, 4  ;;  %s527_s2 = int_to_ptr.vmem [resolvable:$true] %s526_s2 }
  0x2c   :  { %697 = vmatpush1.bf16.msra.mxu1 %v696_v9  ;;  %v709_v21 = vpack.c.bf16 %v220_v19, %v219_v18  ;;  %v712_v23 = vpack.c.bf16 %v222_v22, %v221_v20  ;;  %v224_v25 = vld [vmem:[#allocation5 + $0x28] sm:$0xff]  ;;  %v225_v27 = vld [vmem:[#allocation5 + $0x30] sm:$0xff]  ;;  %v226_v28 = vld [vmem:[#allocation5 + $0x38] sm:$0xff]  ;;  %s854_s14 = scalar_lea.vmem %s527_s2, 128  ;;  %p859_p3 = scmp.lt.s32.totalorder %s527_s2, %s527_s2 }
  0x2d   :  { %801 = vset.pattern.permute.xlu0 %v889_v15  ;;  %699 = vmatprep.subr.bf16.mxu1 %v698_v11  ;;  %v715_v26 = vpack.c.bf16 %v224_v25, %v223_v24  ;;  %v718_v29 = vpack.c.bf16 %v226_v28, %v225_v27  ;;  %v227_v30 = vld [vmem:[#allocation5 + $0x40] sm:$0xff]  ;;  %v228_v31 = vld [vmem:[#allocation5 + $0x48] sm:$0xff]  ;;  %v229_v33 = vld [vmem:[#allocation5 + $0x50] sm:$0xff]  ;;  %p855_p2 = scmp.ne.s32.totalorder %s527_s2, %s854_s14  ;;  %p860_p4 = scmp.lt.s32.totalorder %s854_s14, %s854_s14 }
  0x2e   :  { %52 = vperm.xlu0 %801, %v44_v8   ;;  %710 = vmatpush3.bf16.msra.mxu0 %v709_v21  ;;  %v721_v32 = vpack.c.bf16 %v228_v31, %v227_v30  ;;  %v230_v34 = vld [vmem:[#allocation5 + $0x58] sm:$0xff]  ;;  %v231_v36 = vld [vmem:[#allocation5 + $0x60] sm:$0xff]  ;;  %v232_v37 = vld [vmem:[#allocation5 + $0x68] sm:$0xff] }
  0x2f   :  { %711 = vmatprep.subr.bf16.mxu0 %v891_v17  ;;  %v724_v35 = vpack.c.bf16 %v230_v34, %v229_v33  ;;  %v727_v38 = vpack.c.bf16 %v232_v37, %v231_v36  ;;  %v62_v42 = vld [vmem:[#allocation2 + $0x10] sm:$0xff]  ;;  %v65_v43 = vld [vmem:[#allocation2 + $0x28] sm:$0xff]  ;;  %v68_v46 = vld [vmem:[#allocation2 + $0x40] sm:$0xff]  ;;  %p861_p5 = por %p860_p4, %p859_p3 }
  0x30   :  { %701 = vmatpush1.bf16.msra.mxu1 %v700_v14  ;;  %v703_v45 = vpack.c.bf16 %v65_v43, %v62_v42  ;;  %v71_v47 = vld [vmem:[#allocation2 + $0x58] sm:$0xff]  ;;  %v233_v50 = vld [vmem:[#allocation5 + $0x70] sm:$0xff]  ;;  %v345_v58 = vld [vmem:[#allocation5 + $0x100] sm:$0xff] }
  0x31   :  { %702 = vmatprep.subr.bf16.mxu1 %v891_v17  ;;  %v706_v49 = vpack.c.bf16 %v71_v47, %v68_v46  ;;  %v234_v51 = vld [vmem:[#allocation5 + $0x78] sm:$0xff]  ;;  %v346_v59 = vld [vmem:[#allocation5 + $0x108] sm:$0xff]  ;;  %v329_v60 = vld [vmem:[#allocation5 + $0x80] sm:$0xff]  ;;  %p862_p6 = pnand %p861_p5, %p855_p2 }
  0x32   :  { %713 = vmatpush3.bf16.msra.mxu0 %v712_v23  ;;  %v730_v52 = vpack.c.bf16 %v234_v51, %v233_v50  ;;  %v732_v61 = vpack.c.bf16 %v346_v59, %v345_v58  ;;  %v330_v62 = vld [vmem:[#allocation5 + $0x88] sm:$0xff]  ;;  %v347_v63 = vld [vmem:[#allocation5 + $0x110] sm:$0xff]  ;;  %v348_v0 = vld [vmem:[#allocation5 + $0x118] sm:$0xff] }
  0x33   :  { %714 = vmatprep.subr.bf16.mxu0 %v891_v17  ;;  %v734_v1 = vpack.c.bf16 %v330_v62, %v329_v60  ;;  %v736_v2 = vpack.c.bf16 %v348_v0, %v347_v63  ;;  %v331_v3 = vld [vmem:[#allocation5 + $0x90] sm:$0xff]  ;;  %v332_v4 = vld [vmem:[#allocation5 + $0x98] sm:$0xff]  ;;  %v349_v5 = vld [vmem:[#allocation5 + $0x120] sm:$0xff] }
  0x34   :  { %v350_v6 = vld [vmem:[#allocation5 + $0x128] sm:$0xff]  ;;  %v738_v7 = vpack.c.bf16 %v332_v4, %v331_v3  ;;  %v333_v9 = vld [vmem:[#allocation5 + $0xa0] sm:$0xff]  ;;  %v351_v21 = vld [vmem:[#allocation5 + $0x130] sm:$0xff] }
  0x35   :  { %v740_v8 = vpack.c.bf16 %v350_v6, %v349_v5  ;;  %v334_v10 = vld [vmem:[#allocation5 + $0xa8] sm:$0xff]  ;;  %v352_v22 = vld [vmem:[#allocation5 + $0x138] sm:$0xff]  ;;  %v335_v24 = vld [vmem:[#allocation5 + $0xb0] sm:$0xff] }
  0x36   :  { %716 = vmatpush3.bf16.msra.mxu0 %v715_v26  ;;  %v742_v11 = vpack.c.bf16 %v334_v10, %v333_v9  ;;  %v744_v23 = vpack.c.bf16 %v352_v22, %v351_v21  ;;  %v336_v25 = vld [vmem:[#allocation5 + $0xb8] sm:$0xff]  ;;  %v353_v27 = vld [vmem:[#allocation5 + $0x140] sm:$0xff]  ;;  %v354_v28 = vld [vmem:[#allocation5 + $0x148] sm:$0xff] }
  0x37   :  { %717 = vmatprep.subr.bf16.mxu0 %v891_v17  ;;  %v746_v26 = vpack.c.bf16 %v336_v25, %v335_v24  ;;  %v337_v30 = vld [vmem:[#allocation5 + $0xc0] sm:$0xff]  ;;  %v338_v31 = vld [vmem:[#allocation5 + $0xc8] sm:$0xff]  ;;  %v355_v33 = vld [vmem:[#allocation5 + $0x150] sm:$0xff] }
  0x38   :  { %v356_v34 = vld [vmem:[#allocation5 + $0x158] sm:$0xff]  ;;  %v339_v36 = vld [vmem:[#allocation5 + $0xd0] sm:$0xff]  ;;  %v357_v39 = vld [vmem:[#allocation5 + $0x160] sm:$0xff] }
  0x39   :  { %v340_v37 = vld [vmem:[#allocation5 + $0xd8] sm:$0xff]  ;;  %v341_v42 = vld [vmem:[#allocation5 + $0xe0] sm:$0xff]  ;;  %v342_v43 = vld [vmem:[#allocation5 + $0xe8] sm:$0xff] }
  0x3a   :  { %719 = vmatpush3.bf16.msra.mxu0 %v718_v29  ;;  %v748_v29 = vpack.c.bf16 %v354_v28, %v353_v27  ;;  %v360_v46 = vld [vmem:[#allocation5 + $0x178] sm:$0xff]  ;;  %v433_v51 = vld [vmem:[#allocation5 + $0x180] sm:$0xff]  ;;  %v438_v58 = vld [vmem:[#allocation5 + $0x1a8] sm:$0xff] }
  0x3b   :  { %720 = vmatprep.subr.bf16.mxu0 %v891_v17  ;;  %v439_v60 = vld [vmem:[#allocation5 + $0x1b0] sm:$0xff]  ;;  %v441_v63 = vld [vmem:[#allocation5 + $0x1c0] sm:$0xff]  ;;  %v442_v0 = vld [vmem:[#allocation5 + $0x1c8] sm:$0xff] }
  0x3c   :  { %v777_v3 = vpack.c.bf16 %v442_v0, %v441_v63  ;;  %v443_v4 = vld [vmem:[#allocation5 + $0x1d0] sm:$0xff]  ;;  %v444_v5 = vld [vmem:[#allocation5 + $0x1d8] sm:$0xff]  ;;  %v218_v9 = vld [vmem:[#allocation5 + $0x200] sm:$0xff] }
  0x3d   :  { %v780_v6 = vpack.c.bf16 %v444_v5, %v443_v4  ;;  %v446_v24 = vld [vmem:[#allocation5 + $0x1e8] sm:$0xff]  ;;  %v448_v27 = vld [vmem:[#allocation5 + $0x1f8] sm:$0xff] }
  0x3e   :  { %722 = vmatpush3.bf16.msra.mxu0 %v721_v32  ;;  %v750_v32 = vpack.c.bf16 %v338_v31, %v337_v30 }
  0x3f   :  { %723 = vmatprep.subr.bf16.mxu0 %v891_v17 }
  0x42   :  { %725 = vmatpush3.bf16.msra.mxu0 %v724_v35  ;;  %v752_v35 = vpack.c.bf16 %v356_v34, %v355_v33 }
  0x43   :  { %726 = vmatprep.subr.bf16.mxu0 %v891_v17 }
  0x46   :  { %728 = vmatpush3.bf16.msra.mxu0 %v727_v38  ;;  %v754_v38 = vpack.c.bf16 %v340_v37, %v339_v36 }
  0x47   :  { %729 = vmatprep.subr.bf16.mxu0 %v891_v17 }
  0x4a   :  { %731 = vmatpush3.bf16.msra.mxu0 %v730_v52  ;;  %v434_v52 = vld [vmem:[#allocation5 + $0x188] sm:$0xff] }
  0x4b   :  { %764 = vmatprep.subr.bf16.mxu0 %v891_v17 }
  0xa8   :  { %v49_v40 = vpop.permute.xlu0 %48 }
  0xa9   :  { %vm50_vm2 = vcmp.eq.s32.totalorder %v46_v41, %v49_v40  ;;  %v358_v40 = vld [vmem:[#allocation5 + $0x168] sm:$0xff] }
  0xad   :  { %v53_v44 = vpop.permute.xlu0 %52 }
  0xae   :  { %vm54_vm3 = vcmp.eq.s32.totalorder %v46_v41, %v53_v44  ;;  %v756_v41 = vpack.c.bf16 %v358_v40, %v357_v39  ;;  %v758_v44 = vpack.c.bf16 %v342_v43, %v341_v42 }
  0xaf   :  { %vm55_vm4 = vmor %vm50_vm2, %vm54_vm3 }
  0xb0   :  { %vm57_vm6 = vmor %vm55_vm4, %vm56_vm1 }
  0xb1   :  { %v536_v48 = vsel %vm57_vm6, 1.0, %v890_v16 }
  0xb2   :  { %537 = vmatmul.mubr.msk.f32.vlgmr.msra.gmra.mrb[0].mxu1 %vm72_vm5, %v536_v48 }
  0xb3   :  { %704 = vmatpush3.bf16.msra.mxu1 %v703_v45  ;;  %621 = vmatprep.mubr.msk.f32.mxu1 %vm892_vm0, %v890_v16  ;;  %v359_v45 = vld [vmem:[#allocation5 + $0x170] sm:$0xff] }
  0xb4   :  { %705 = vmatprep.subr.bf16.mxu1 %v891_v17  ;;  %v760_v47 = vpack.c.bf16 %v360_v46, %v359_v45 }
  0xb7   :  { %707 = vmatpush3.bf16.msra.mxu1 %v706_v49  ;;  %v344_v49 = vld [vmem:[#allocation5 + $0xf8] sm:$0xff] }
  0xb8   :  { %733 = vmatprep.subr.bf16.mxu1 %v732_v61  ;;  %v440_v61 = vld [vmem:[#allocation5 + $0x1b8] sm:$0xff] }
  0xb9   :  { %v774_v62 = vpack.c.bf16 %v440_v61, %v439_v60 }
  0xba   :  { %622 = vmatmul.mubr.msk.f32.vlgmr.msra.gmra.mrb[2].mxu1 %vm72_vm5, %v536_v48  ;;  %v343_v48 = vld [vmem:[#allocation5 + $0xf0] sm:$0xff] }
  0xbb   :  { %735 = vmatpush3.bf16.msra.mxu1 %v734_v1  ;;  %v762_v50 = vpack.c.bf16 %v344_v49, %v343_v48 }
  0xbc   :  { %737 = vmatprep.subr.bf16.mxu1 %v736_v2 }
  0xbf   :  { %739 = vmatpush3.bf16.msra.mxu1 %v738_v7 }
  0xc0   :  { %741 = vmatprep.subr.bf16.mxu1 %v740_v8 }
  0xc3   :  { %743 = vmatpush3.bf16.msra.mxu1 %v742_v11 }
  0xc4   :  { %745 = vmatprep.subr.bf16.mxu1 %v744_v23  ;;  %v445_v23 = vld [vmem:[#allocation5 + $0x1e0] sm:$0xff] }
  0xc5   :  { %v783_v25 = vpack.c.bf16 %v446_v24, %v445_v23 }
  0xc7   :  { %747 = vmatpush3.bf16.msra.mxu1 %v746_v26  ;;  %v447_v26 = vld [vmem:[#allocation5 + $0x1f0] sm:$0xff] }
  0xc8   :  { %749 = vmatprep.subr.bf16.mxu1 %v748_v29  ;;  %v786_v28 = vpack.c.bf16 %v448_v27, %v447_v26 }
  0xcb   :  { %751 = vmatpush3.bf16.msra.mxu1 %v750_v32 }
  0xcc   :  { %753 = vmatprep.subr.bf16.mxu1 %v752_v35 }
  0xcf   :  { %755 = vmatpush3.bf16.msra.mxu1 %v754_v38 }
  0xd0   :  { %757 = vmatprep.subr.bf16.mxu1 %v756_v41 }
  0xd3   :  { %759 = vmatpush3.bf16.msra.mxu1 %v758_v44 }
  0xd4   :  { %761 = vmatprep.subr.bf16.mxu1 %v760_v47 }
  0xd7   :  { %763 = vmatpush3.bf16.msra.mxu1 %v762_v50 }
 0x185   :  { %v142_v53 = vpop.f32.mrb[0].mxu1 }
 0x186   :  { %v217_v54 = vmax.f32 %v142_v53, 0.0  ;;  %v144_v55 = vpop.f32.mrb[1].mxu1  ;;  %v435_v53 = vld [vmem:[#allocation5 + $0x190] sm:$0xff] }
 0x188   :  { %657 = vmatmul.mubr.f32.vlgmr.msra.gmra.mrb[0].mxu0 %v217_v54  ;;  %v765_v54 = vpack.c.bf16 %v434_v52, %v433_v51 }
 0x189   :  { %691 = vmatprep.mubr.msk.f32.mxu0 %vm892_vm0, %v890_v16 }
 0x18a   :  { %766 = vmatpush3.bf16.msra.mxu0 %v765_v54 }
 0x18b   :  { %767 = vmatprep.subr.bf16.mxu0 %v891_v17 }
 0x18d   :  { %v213_v56 = vpop.f32.mrb[2].mxu1 }
 0x18e   :  { %317 = vmax.xlane.f32.xlu1 %v213_v56  ;;  %v623_v57 = vpop.f32.mrb[3].mxu1 }
 0x18f   :  { %v437_v57 = vld [vmem:[#allocation5 + $0x1a0] sm:$0xff] }
 0x190   :  { %v771_v59 = vpack.c.bf16 %v438_v58, %v437_v57 }
 0x192   :  { %306 = vmax.xlane.f32.xlu1 %v144_v55 }
 0x21b   :  { %v318_v12 = vpop.xlane.xlu1 %317 }
 0x21c   :  { %v319_v13 = vsub.f32 %v213_v56, %v318_v12 }
 0x21e   :  { %v320_v14 = vmul.f32 1.442695, %v319_v13 }
 0x21f   :  { %v307_v15 = vpop.xlane.xlu1 %306 }
 0x220   :  { %802 = vpow2.f32 %v320_v14  ;;  %v308_v16 = vsub.f32 %v144_v55, %v307_v15  ;;  %v436_v55 = vld [vmem:[#allocation5 + $0x198] sm:$0xff] }
 0x221   :  { %v768_v56 = vpack.c.bf16 %v436_v55, %v435_v53 }
 0x222   :  { %v309_v18 = vmul.f32 1.442695, %v308_v16 }
 0x223   :  { %769 = vmatpush3.bf16.msra.mxu0 %v768_v56 }
 0x224   :  { %804 = vpow2.f32 %v309_v18  ;;  %770 = vmatprep.subr.bf16.mxu0 %v891_v17 }
 0x227   :  { %772 = vmatpush3.bf16.msra.mxu0 %v771_v59 }
 0x228   :  { %773 = vmatprep.subr.bf16.mxu0 %v891_v17 }
 0x22a   :  { %v960_v19 = vpop.eup %802 }
 0x22b   :  { %322 = vadd.xlane.f32.xlu1 %v960_v19  ;;  %775 = vmatpush3.bf16.msra.mxu0 %v774_v62 }
 0x22c   :  { %776 = vmatprep.subr.bf16.mxu0 %v891_v17 }
 0x22e   :  { %v963_v20 = vpop.eup %804 }
 0x22f   :  { %311 = vadd.xlane.f32.xlu0 %v963_v20  ;;  %778 = vmatpush3.bf16.msra.mxu0 %v777_v3 }
 0x230   :  { %779 = vmatprep.subr.bf16.mxu0 %v891_v17 }
 0x233   :  { %781 = vmatpush3.bf16.msra.mxu0 %v780_v6 }
 0x234   :  { %782 = vmatprep.subr.bf16.mxu0 %v891_v17 }
 0x237   :  { %784 = vmatpush3.bf16.msra.mxu0 %v783_v25 }
 0x238   :  { %785 = vmatprep.subr.bf16.mxu0 %v891_v17 }
 0x23b   :  { %787 = vmatpush3.bf16.msra.mxu0 %v786_v28 }
 0x25b   :  { %v301_v1 = vpop.f32.mrb[0].mxu0 }
 0x25c   :  { %v658_v2 = vpop.f32.mrb[1].mxu0  ;;  %v302_v10 = vadd.f32 %v301_v1, %v218_v9 }
 0x25e   :  { %v305_v13 = vmax.f32 %v302_v10, 0.0 }
 0x2b8   :  { %v323_v7 = vpop.xlane.xlu1 %322 }
 0x2b9   :  { %806 = vrcp.f32 %v323_v7 }
 0x2bc   :  { %v312_v8 = vpop.xlane.xlu0 %311 }
 0x2bd   :  { %808 = vrcp.f32 %v312_v8 }
 0x2c3   :  { %v807_v11 = vpop.eup %806 }
 0x2c4   :  { %v325_v12 = vmul.f32 32.0, %v807_v11 }
 0x2c6   :  { %v326_v14 = vmul.f32 %v960_v19, %v325_v12  ;;  %v328_v19 = vld [vmem:[#allocation5 + $0x208] sm:$0xff] }
 0x2c7   :  { %v809_v15 = vpop.eup %808 }
 0x2c8   :  { %v314_v16 = vmul.f32 32.0, %v809_v15  ;;  %v327_v18 = vmul.f32 %v326_v14, %v305_v13 }
 0x2ca   :  { %v315_v21 = vmul.f32 %v963_v20, %v314_v16  ;;  %425 = vmatprep.mubr.f32.mxu1 %v327_v18  ;;  %v432_v20 = vld [vmem:[#allocation5 + $0x210] sm:$0xff] }
 0x2cc   :  { %v316_v22 = vmul.f32 %v315_v21, %v305_v13 }
 0x2ce   :  { %426 = vmatmul.mubr.f32.vlgmr.msra.gmra.mrb[4].mxu1 %v316_v22 }
 0x3a1   :  { %v593_v29 = vpop.f32.mrb[4].mxu1 }
 0x3a2   :  { %v594_v30 = vpop.f32.mrb[5].mxu1 }
 0x3a3   :  { %v595_v31 = vadd.f32 %v594_v30, %v593_v29 }
 0x3a5   :  { %v428_v32 = vadd.f32 %v595_v31, %v328_v19 }
 0x3a7   :  { %v431_v33 = vmax.f32 %v428_v32, 0.0 }
 0x3a9   :  { %692 = vmatmul.mubr.f32.vlgmr.msra.gmra.mrb[2].mxu0 %v431_v33 }
 0x47c   :  { %v515_v34 = vpop.f32.mrb[2].mxu0 }
 0x47d   :  { %v516_v35 = vadd.f32 %v515_v34, %v432_v20  ;;  %v693_v36 = vpop.f32.mrb[3].mxu0 }
 0x47f   :  { %519 = vst [vmem:[#allocation7] sm:$0xff] %v516_v35 }
 0x480   :  { %865 = shalt.err (!%p862_p6)
}
 0x481   :  { %s866_s17 = scalar_lea.hbm %s990_s3, 128 }
 0x482   :  { %p867_p7 = scmp.ne.s32.totalorder %s990_s3, %s866_s17  ;;  %p870_p8 = scmp.lt.u32.totalorder %s866_s17, %s990_s3 }
 0x484   :  { %p872_p9 = pnand %p870_p8, %p867_p7 }
 0x486   :  { %875 = shalt.err (!%p872_p9)
}
 0x487   :  { %529 = dma.vmem_to_hbm [thread:$0]  %s527_s2, 128, %s990_s3, [#allocation4]  }
 0x488   :  { %880 = dma.done.wait [#allocation4], 128  }
 0x489   :  { %881 = vsyncadd [#allocation4], 4294967168 }
 0x48a   :  { %533 = vsyncpa [#allocation3], 1 }
 0x48b   :  { %534 = vsyncpa [#allocation6], 1 }
 0x48c   :  { %535 = vsyncpa [#allocation4], 1 }

</bundles_post_ra>
